<compile_context>
chip_gen: v6e
topology: v6e:2x2x1
jax: 0.10.0
libtpu: 0.0.40
codegen_flags: <defaults>
</compile_context>

<pallas_src>
import functools

import jax
import jax.numpy as jnp
from jax import lax
from jax.experimental import pallas as pl
from jax.experimental.pallas import tpu as pltpu


_TARGET_BLOCK_BYTES = 4 * 1024 * 1024    # per input block (pipeline double-buffers it)
_VMEM_LIMIT_BYTES = 32 * 1024 * 1024     # explicit scoped-VMEM limit (fits all chips)


def _pow_p(x, p):
    """x ** p. Integer p -> VALU multiply chain; fractional p -> f32 pow (EUP)."""
    p_int = int(round(p))
    if float(p_int) == float(p):
        return lax.integer_pow(x, p_int)
    return jnp.power(x.astype(jnp.float32), jnp.float32(p))


def _gem_full_kernel(x_ref, o_ref, *, p, eps, inv_hw):
    """Path A: one block holds the full spatial extent -> single-pass GeM."""
    x = x_ref[...]                                            # (bn, bc, hw)
    xc = jnp.maximum(x, jnp.asarray(eps, x.dtype))
    xp = _pow_p(xc, p)
    # One cross-lane reduce per output element (f32 accumulation).
    s = jnp.sum(xp.astype(jnp.float32), axis=-1, keepdims=True)   # (bn, bc, 1)
    m = s * jnp.float32(inv_hw)
    o_ref[...] = jnp.power(m, jnp.float32(1.0 / p)).astype(o_ref.dtype)


def _gem_tiled_kernel(x_ref, o_ref, acc_ref, *, p, eps, inv_hw, hw, bhw, has_partial):
    """Path B: streaming spatial reduction for very large H*W (fallback)."""
    k = pl.program_id(2)

    @pl.when(k == 0)
    def _():
        acc_ref[...] = jnp.zeros_like(acc_ref)

    def accumulate(masked):
        x = x_ref[...]                                        # (bn, bc, bhw), bhw wide
        xc = jnp.maximum(x, jnp.asarray(eps, x.dtype))
        xp = _pow_p(xc, p).astype(jnp.float32)
        if masked:
            # Only the last (partial) spatial tile pays the iota+where mask.
            # Out-of-range columns (unspecified DMA'd data, possibly NaN/Inf)
            # are discarded by jnp.where before they can reach the accumulator.
            col = k * bhw + lax.broadcasted_iota(jnp.int32, xp.shape, xp.ndim - 1)
            xp = jnp.where(col < hw, xp, jnp.zeros_like(xp))
        # bhw spans many vregs per row here, so the per-tile reduce is
        # overwhelmingly VPU adds; the 7-step cross-lane tail is amortized.
        acc_ref[...] += jnp.sum(xp, axis=-1, keepdims=True)   # (bn, bc, 1)

    if has_partial:
        last = pl.num_programs(2) - 1

        @pl.when(k < last)
        def _():
            accumulate(False)

        @pl.when(k == last)
        def _():
            accumulate(True)
    else:
        accumulate(False)

    @pl.when(k == pl.num_programs(2) - 1)
    def _():
        m = acc_ref[...] * jnp.float32(inv_hw)
        o_ref[...] = jnp.power(m, jnp.float32(1.0 / p)).astype(o_ref.dtype)


def gem_pallas(x, p=3.0, eps=1e-6, *, _target_block_bytes=_TARGET_BLOCK_BYTES):
    """GeM pooling. x: (N, C, H, W) float array -> (N, C, 1, 1)."""
    N, C, H, W = x.shape
    hw = H * W
    x_flat = x.reshape(N, C, hw)
    itemsize = jnp.dtype(x_flat.dtype).itemsize
    row_bytes = hw * itemsize

    p = float(p)
    eps = float(eps)
    inv_hw = 1.0 / float(hw)

    c_gran = C if C < 8 else 8             # minimum legal channel block (sublanes)

    compiler_args = dict(vmem_limit_bytes=_VMEM_LIMIT_BYTES)

    if c_gran * row_bytes <= _target_block_bytes:
        # ------------ Path A: full spatial extent per block ------------
        rows_fit = max(1, _target_block_bytes // row_bytes)
        if C <= rows_fit:
            bc = C
            bn = max(1, min(N, _target_block_bytes // max(1, C * row_bytes)))
        else:
            bc = max(8, (rows_fit // 8) * 8)   # multiple of 8 sublanes
            bn = 1

        # v7x megacore: make sure the parallel grid has >= 2 blocks when possible.
        if pl.cdiv(N, bn) * pl.cdiv(C, bc) < 2:
            if N >= 2:
                bn = (N + 1) // 2
            elif C >= 16:
                cand = (((C + 1) // 2) + 7) // 8 * 8
                if cand < C:
                    bc = cand

        grid = (pl.cdiv(N, bn), pl.cdiv(C, bc))
        kernel = functools.partial(_gem_full_kernel, p=p, eps=eps, inv_hw=inv_hw)

        out_flat = pl.pallas_call(
            kernel,
            out_shape=jax.ShapeDtypeStruct((N, C, 1), x.dtype),
            grid_spec=pltpu.PrefetchScalarGridSpec(
                num_scalar_prefetch=0,
                grid=grid,
                in_specs=[pl.BlockSpec((bn, bc, hw), lambda i, j: (i, j, 0))],
                out_specs=pl.BlockSpec((bn, bc, 1), lambda i, j: (i, j, 0)),
            ),
            compiler_params=pltpu.CompilerParams(
                dimension_semantics=("parallel", "parallel"),
                **compiler_args,
            ),
        )(x_flat)
    else:
        # ------------ Path B: huge H*W -> tiled streaming reduction ------------
        bn = 1
        bc = c_gran
        lanes_fit = max(1, _target_block_bytes // max(1, bn * bc * itemsize))
        bhw = max(128, (lanes_fit // 128) * 128)               # lane-aligned tile
        bhw = min(bhw, ((hw + 127) // 128) * 128)
        grid = (pl.cdiv(N, bn), pl.cdiv(C, bc), pl.cdiv(hw, bhw))
        has_partial = (hw % bhw) != 0

        kernel = functools.partial(
            _gem_tiled_kernel, p=p, eps=eps, inv_hw=inv_hw,
            hw=hw, bhw=bhw, has_partial=has_partial)

        out_flat = pl.pallas_call(
            kernel,
            out_shape=jax.ShapeDtypeStruct((N, C, 1), x.dtype),
            grid_spec=pltpu.PrefetchScalarGridSpec(
                num_scalar_prefetch=0,
                grid=grid,
                in_specs=[pl.BlockSpec((bn, bc, bhw), lambda i, j, k: (i, j, k))],
                out_specs=pl.BlockSpec((bn, bc, 1), lambda i, j, k: (i, j, 0)),
                scratch_shapes=[pltpu.VMEM((bn, bc, 1), jnp.float32)],
            ),
            compiler_params=pltpu.CompilerParams(
                dimension_semantics=("parallel", "parallel", "arbitrary"),
                **compiler_args,
            ),
        )(x_flat)

    return out_flat.reshape(N, C, 1, 1)


def gem_reference(x, p=3.0, eps=1e-6):
    """Pure-JAX reference mirroring the PyTorch gem()."""
    xc = jnp.maximum(x, eps)
    pooled = jnp.mean(xc ** p, axis=(-2, -1), keepdims=True)
    return pooled ** (1.0 / p)


if __name__ == "__main__":
    # Module __init__: p=3 (non-trainable scalar), eps=1e-6. No learned weights.
    key = jax.random.PRNGKey(0)

    # Main small-shape test (Path A, 128-aligned spatial extent).
    N, C, H, W = 2, 4, 16, 16
    x = jax.random.normal(key, (N, C, H, W), dtype=jnp.float32)
    out = jax.block_until_ready(gem_pallas(x, p=3.0, eps=1e-6))
    ref = gem_reference(x, p=3.0, eps=1e-6)
    assert out.shape == (N, C, 1, 1), out.shape
    assert jnp.allclose(out, ref, rtol=1e-5, atol=1e-6)

    # Non-128-aligned spatial extent (Path A full-extent block: no padding DMA,
    # no mask).
    x2 = jax.random.normal(jax.random.PRNGKey(1), (3, 4, 14, 14), dtype=jnp.float32)
    out2 = jax.block_until_ready(gem_pallas(x2, p=3.0, eps=1e-6))
    ref2 = gem_reference(x2, p=3.0, eps=1e-6)
    assert out2.shape == (3, 4, 1, 1), out2.shape
    assert jnp.allclose(out2, ref2, rtol=1e-5, atol=1e-6)

    # Force the tiled fallback (Path B) on a small shape by shrinking the block
    # budget; exercises the accumulator + last-tile mask path on real hardware.
    x3 = jax.random.normal(jax.random.PRNGKey(2), (2, 4, 20, 20), dtype=jnp.float32)
    out3 = jax.block_until_ready(gem_pallas(x3, p=3.0, eps=1e-6,
                                            _target_block_bytes=2048))
    ref3 = gem_reference(x3, p=3.0, eps=1e-6)
    assert out3.shape == (2, 4, 1, 1), out3.shape
    assert jnp.allclose(out3, ref3, rtol=1e-5, atol=1e-6)

    print("KERNEL_OK")
</pallas_src>

<mosaic_0001>
module attributes {stable_mosaic.version = 11 : i64} {
  func.func @_gem_full_kernel(%arg0: i32, %arg1: i32, %arg2: memref<1x4x256xf32, #tpu.memory_space<vmem>>, %arg3: memref<1x4x1xf32, #tpu.memory_space<vmem>>) attributes {dimension_semantics = [#tpu.dimension_semantics<parallel>, #tpu.dimension_semantics<parallel>], iteration_bounds = array<i64: 2, 1>, scalar_prefetch = 0 : i64, scratch_operands = 0 : i64, tpu.core_type = #tpu.core_type<tc>, window_params = [{transform_indices = @transform_0, window_bounds = array<i64: 1, 4, 256>}, {transform_indices = @transform_1, window_bounds = array<i64: 1, 4, 1>}]} {
    %c0 = arith.constant 0 : index
    %c0_0 = arith.constant 0 : index
    %c0_1 = arith.constant 0 : index
    %0 = vector.load %arg2[%c0, %c0_0, %c0_1] : memref<1x4x256xf32, #tpu.memory_space<vmem>>, vector<1x4x256xf32>
    %cst = arith.constant 9.99999997E-7 : f32
    %1 = vector.broadcast %cst : f32 to vector<1x4x256xf32>
    %2 = arith.maximumf %0, %1 : vector<1x4x256xf32>
    %3 = arith.mulf %2, %2 : vector<1x4x256xf32>
    %4 = arith.mulf %2, %3 : vector<1x4x256xf32>
    %cst_2 = arith.constant dense<0.000000e+00> : vector<1x4xf32>
    %5 = vector.multi_reduction <add>, %4, %cst_2 [2] : vector<1x4x256xf32> to vector<1x4xf32>
    %6 = vector.shape_cast %5 : vector<1x4xf32> to vector<1x4x1xf32>
    %cst_3 = arith.constant 3.906250e-03 : f32
    %7 = vector.broadcast %cst_3 : f32 to vector<1x4x1xf32>
    %8 = arith.mulf %6, %7 : vector<1x4x1xf32>
    %cst_4 = arith.constant 0.333333343 : f32
    %9 = vector.broadcast %cst_4 : f32 to vector<1x4x1xf32>
    %10 = math.powf %8, %9 : vector<1x4x1xf32>
    %c0_5 = arith.constant 0 : index
    %c0_6 = arith.constant 0 : index
    %c0_7 = arith.constant 0 : index
    %11 = vector.load %arg3[%c0_5, %c0_6, %c0_7] : memref<1x4x1xf32, #tpu.memory_space<vmem>>, vector<1x4x1xf32>
    tpu.vector_store %arg3[%c0_5, %c0_6, %c0_7], %10 {strides = array<i32>} : memref<1x4x1xf32, #tpu.memory_space<vmem>>, vector<1x4x1xf32>,
    return
  }
  func.func @transform_0(%arg0: i32, %arg1: i32) -> (i32, i32, i32) {
    %c0_i32 = arith.constant 0 : i32
    %c0_i32_0 = arith.constant 0 : i32
    return %arg0, %arg1, %c0_i32 : i32, i32, i32
  }
  func.func @transform_1(%arg0: i32, %arg1: i32) -> (i32, i32, i32) {
    %c0_i32 = arith.constant 0 : i32
    %c0_i32_0 = arith.constant 0 : i32
    return %arg0, %arg1, %c0_i32 : i32, i32, i32
  }
}

</mosaic_0001>

<bundles_post_ra>
// kernel: tpu_custom_call.1
= control target key start
LH: loop header
LB: loop body
LE: loop exit
PB: predicated region body
PF: predicated region fallthrough
CT: control target
= control target key end

     0   :  { %6 = vsyncpa [#allocation3], 0  ;;  %s541_s0 = inlined_call_operand.hbm [shape: f32[2,4,256], index: 0, kind: input, shape index: {}]   ;;  %s542_s1 = inlined_call_operand.vmem [shape: f32[2,4,1], index: 1, kind: output, shape index: {}]  }
   0x1   :  { %8 = vsyncpa [#allocation3 + $0x1], 0  ;;  %s441_s6 = smov 0   ;;  %s443_s7 = smov 0  }
   0x2   :  { %s445_s8 = smov 0   ;;  %s447_s9 = smov 0  }
   0x3   :  { %s449_s10 = smov 0   ;;  %s451_s11 = smov 0  }
   0x4 LB: > { %s260_s12 = sadd.s32 4294967295, %s428_s11   ;;  %s26_s13 = sadd.s32 1, %s424_s10  ;;  %s428_s11 = sphi %s451_s11, %s14_s11   ;;  %s424_s10 = sphi %s449_s10, %s550_s10   ;;  %s420_s9 = sphi %s447_s9, %s549_s9   ;;  %s416_s8 = sphi %s445_s8, %s548_s8   ;;  %s412_s7 = sphi %s443_s7, %s547_s7   ;;  %s408_s6 = sphi %s441_s6, %s546_s6  }
   0x5   : > { %p28_p0 = scmp.ge.s32.totalorder %s26_s13, 2  ;;  %s35_s14 = sadd.s32 1, %s416_s8 }
   0x6   : > { %p42_p1 = scmp.ne.s32.totalorder %s416_s8, %s412_s7  ;;  %p43_p2 = scmp.eq.s32.totalorder %s428_s11, 0 }
   0x7   : > { %s552_s13 = smov (%p28_p0, %s26_s13), 0  ;;  %p48_p4 = scmp.ne.s32.totalorder %s412_s7, %s408_s6 }
   0x8   : > { %p477_p3 = por %p43_p2, %p42_p1  ;;  %s30_s16 = ssub.s32 %s424_s10, %s552_s13 }
   0x9   : > { %p49_p5 = scmp.eq.s32.totalorder %s260_s12, 0  ;;  %p33_p6 = scmp.eq.s32.totalorder %s30_s16, 0 }
   0xa   : > { %p297_p8 = scmp.lt.s32.totalorder %s428_s11, 2  ;;  %s100_s19 = sand.u32 1, %s416_s8  }
   0xb   : > { %p484_p7 = por %p49_p5, %p48_p4  ;;  %s272_s20 = sshll.u32 %s424_s10, 7 }
   0xc   : > { %s490_s18 = scalar_select %p33_p6, %s416_s8, %s35_s14  }
   0xd   : > { %s264_s21 = sshll.u32 %s100_s19, 3  ;;  %s112_s24 = scalar_lea.hbm %s541_s0, %s272_s20 }
   0xe   : > { %s104_s25 = scalar_lea.vmem [#allocation2], %s264_s21  ;;  %p499_p9 = pnand %p297_p8, %p477_p3 }
   0xf   : > { %s114_s26 = sshll.u32 %s104_s25, 4  ;;  %p267_p10 = scmp.ge.s32.totalorder %s428_s11, 1  ;;  %s115_s26 = int_to_ptr.vmem [resolvable:$true] %s114_s26 }
  0x10   : > { %p119_p11 = scmp.lt.s32.totalorder %s428_s11, 3  ;;  %s101_s28 = scalar_lea.sflag [#allocation3], %s100_s19 }
  0x11   : > { %p352_p12 = pneg %p499_p9  ;;  %s363_s29 = scalar_lea.vmem %s115_s26, 128 }
  0x12   : > { %p364_p13 = scmp.ne.s32.totalorder %s115_s26, %s363_s29  ;;  %s430_s30 = smov [#allocation2]  }
  0x13   : > { %s368_s2 = sshll.u32 %s430_s30, 4  ;;  %s369_s2 = int_to_ptr.vmem [resolvable:$false] %s368_s2 }
  0x14   : > { %p366_p0 = pnand %p364_p13, %p352_p12  ;;  %s370_s3 = scalar_lea.vmem %s369_s2, 256 }
  0x15   : > { %p371_p2 = scmp.lt.s32.totalorder %s115_s26, %s369_s2  ;;  %p372_p3 = scmp.lt.s32.totalorder %s370_s3, %s363_s29 }
  0x16   : > { %p367_p1 = pneg %p366_p0 }
  0x17   : > { %p373_p4 = por %p372_p3, %p371_p2 }
  0x19   : > { %p374_p5 = pnand %p373_p4, %p367_p1 }
  0x1b   : > { %377 = shalt.err (!%p374_p5)
}
  0x1c   : > { %296 = dma.hbm_to_vmem [thread:$0]  (!%p499_p9), %s112_s24, 128, %s115_s26, %s101_s28  }
  0x1d   : > { %p120_p6 = pnand %p267_p10, %p119_p11 }
  0x1e   : > { %s125_s4 = sand.u32 (!%p120_p6), 1, %s412_s7  }
  0x1f   : > { %123 = sbr.rel (%p120_p6) target bundleno = 229 (0xe5), region = 24  ;;  %s268_s5 = sshll.u32 (!%p120_p6), %s125_s4, 3 }
  0x20   : > { %s126_s6 = scalar_lea.sflag (!%p120_p6), [#allocation3], %s125_s4  ;;  %s129_s12 = scalar_lea.vmem (!%p120_p6), [#allocation2], %s268_s5 }
  0x24   : > { %403 = dma.done.wait (%p484_p7), %s126_s6, 128  }
  0x25   : > { %405 = vsyncadd (%p484_p7), %s126_s6, 4294967168  ;;  %v157_v0 = vld [vmem:[%s129_s12] sm:$0xff]  ;;  %vm164_vm0 = vcmask 1043456   ;;  %p150_p7 = scmp.lt.s32.totalorder %s420_s9, 1  ;;  %vm172_vm5 = vcmask 3072  }
  0x26   : > { %v158_v1 = vmax.f32 %v157_v0, 1e-06 }
  0x27   : > { %s554_s9 = smov (!%p150_p7, %s420_s9), 1 }
  0x28   : > { %v159_v2 = vmul.f32 %v158_v1, %v158_v1  ;;  %s269_s14 = sshll.u32 %s554_s9, 2 }
  0x29   : > { %s156_s17 = scalar_lea.vmem %s542_s1, %s269_s14 }
  0x2a   : > { %v160_v3 = vmul.f32 %v159_v2, %v158_v1 }
  0x2c   : > { %v162_v4 = vcombine.high %v160_v3, %v160_v3  ;;  %v165_v5 = vsel %vm164_vm0, %v160_v3, 0.0 }
  0x2e   : > { %v166_v6 = vsel %vm164_vm0, %v162_v4, 0.0 }
  0x2f   : > { %v167_v7 = vadd.f32 %v166_v6, %v165_v5 }
  0x31   : > { %168 = vadd.xlane.f32.xlu0 %v167_v7 }
  0xba   : > { %v169_v8 = vpop.xlane.xlu0 %168 }
  0xbb   : > { %v170_v9 = vmul.f32 0.00390625, %v169_v8 }
  0xbd   : > { %v275_v10 = vand.u32 2147483647, %v170_v9  ;;  %v279_v13 = vand.u32 2147483648, %v170_v9  ;;  %vm274_vm3 = vcmp.lt.f32.partialorder %v170_v9, 0.0  ;;  %vm273_vm4 = vcmp.eq.f32.partialorder %v170_v9, 0.0 }
  0xbf   : > { %346 = vlog2.f32 %v275_v10  ;;  %vm283_vm1 = vweird.f32 %v275_v10  ;;  %vm285_vm2 = vcmp.eq.f32.partialorder %v275_v10, 0.0  ;;  %vm276_vm6 = vcmp.eq.f32.partialorder %v275_v10, inf }
  0xcc   : > { %v347_v11 = vpop.eup %346 }
  0xcd   : > { %v280_v12 = vmul.f32 0.33333334, %v347_v11 }
  0xcf   : > { %348 = vpow2.f32 %v280_v12 }
  0xdc   : > { %v349_v14 = vpop.eup %348 }
  0xdd   : > { %v282_v15 = vor.u32 %v349_v14, %v279_v13 }
  0xdf   : > { %v284_v16 = vsel %vm283_vm1, %v170_v9, %v282_v15 }
  0xe0   : > { %v287_v17 = vsel %vm285_vm2, %v279_v13, %v284_v16 }
  0xe1   : > { %v288_v18 = vsel %vm274_vm3, nan, %v287_v17 }
  0xe2   : > { %v289_v19 = vsel %vm273_vm4, 0.0, %v288_v18 }
  0xe3   : > { %v290_v20 = vsel %vm276_vm6, inf, %v289_v19 }
  0xe4   : > { %173 = vst.msk [vmem:[%s156_s17] sm:$0xf] %vm172_vm5, %v290_v20 }
  0xe5 PF: > { %s14_s11 = sadd.s32 1, %s428_s11   ;;  %s546_s6 = smov %s412_s7 }
  0xe6   : > { %p11_p8 = scmp.ge.s32.totalorder %s14_s11, 4   ;;  %s547_s7 = smov %s416_s8 }
  0xe7   : > { %s548_s8 = smov %s490_s18  ;;  %s549_s9 = smov %s424_s10 }
  0xe8   : > { %s550_s10 = smov %s552_s13  ;;  %13 = sbr.rel (!%p11_p8) target bundleno = 4 (0x4), region = 64 }
  0xed   :  { %199 = vsyncpa [#allocation3], 1 }
  0xee   :  { %201 = vsyncpa [#allocation3 + $0x1], 1 }

</bundles_post_ra>
